<compile_context>
chip_gen: v6e
topology: v6e:2x2x1
jax: 0.10.0
libtpu: 0.0.40
codegen_flags: <defaults>
</compile_context>

<pallas_src>
import math

import jax
import jax.numpy as jnp
from jax.experimental import pallas as pl
from jax.experimental.pallas import tpu as pltpu

LOG_2PI = math.log(2.0 * math.pi)


def _tanh_policy_kernel(obs_ref, w1_ref, b1_ref, wh_ref, bh_ref, eps_ref, out_ref):
    A = eps_ref.shape[-1]

    obs = obs_ref[...]

    # Hidden layer (MXU matmul in the weight dtype, f32 accumulate, VPU tanh in f32).
    h = jnp.tanh(
        jnp.dot(obs.astype(w1_ref.dtype), w1_ref[...],
                preferred_element_type=jnp.float32) + b1_ref[...]
    )

    # Fused Gaussian head: one [HID, 2*A] matmul -> [mean | log_std].
    y = jnp.dot(h.astype(wh_ref.dtype), wh_ref[...],
                preferred_element_type=jnp.float32) + bh_ref[...]
    mean = y[:, :A]
    log_std = jnp.clip(y[:, A:], -20.0, 2.0)
    std = jnp.exp(log_std)

    eps = eps_ref[...]
    pre_action = mean + std * eps

    # Pre-tanh (Gaussian) log-prob, summed over action dim, keepdim.
    pretanh_log_prob = jnp.sum(
        -0.5 * eps * eps - log_std - 0.5 * LOG_2PI, axis=-1, keepdims=True
    )

    # TanhPolicyModule.forward correction (exact semantics, eps=1e-8).
    action = jnp.tanh(pre_action)
    log_prob = pretanh_log_prob - jnp.sum(
        jnp.log(1.0 - action * action + 1e-8), axis=-1, keepdims=True
    )

    # Single lane-dense output slab: [action | pretanh_action | log_prob | pretanh_log_prob].
    out_ref[...] = jnp.concatenate(
        [action, pre_action, log_prob, pretanh_log_prob], axis=-1
    )


def _round_up(x, m):
    return ((x + m - 1) // m) * m


def _choose_batch_tile(B):
    # Largest multiple of 8 (f32 sublane) that keeps the double-buffered
    # per-tile streams comfortably under the scoped VMEM budget; capped at 1024
    # rows (amortizes the ~0.35us per-grid-step overhead without blowing v7x's
    # smaller 64 MiB VMEM).
    tb = min(1024, _round_up(B, 8))
    return max(8, (tb // 8) * 8)


def tanh_policy_forward(obs, params, eps, matmul_dtype=jnp.float32):
    """Returns (action, info) like TanhPolicyModule.forward(return_info=True,
    return_pretanh_action=True)."""
    B, OBS = obs.shape
    HID = params["w1"].shape[1]
    A = params["wm"].shape[1]
    OUT_W = 2 * A + 2

    # Fuse the two head matmuls into one [HID, 2*A] weight / [1, 2*A] bias.
    whead = jnp.concatenate([params["wm"], params["ws"]], axis=1)
    bhead = jnp.concatenate([params["bm"], params["bs"]], axis=1).astype(jnp.float32)
    w1 = params["w1"].astype(matmul_dtype)
    b1 = params["b1"].astype(jnp.float32)
    whead = whead.astype(matmul_dtype)

    # Batch tiling (pad so every grid block is full -> no partial stores).
    TB = _choose_batch_tile(B)
    Bp = _round_up(B, TB)
    if Bp != B:
        pad = Bp - B
        obs = jnp.pad(obs, ((0, pad), (0, 0)))
        eps = jnp.pad(eps, ((0, pad), (0, 0)))
    grid = (Bp // TB,)

    w_bytes = jnp.dtype(matmul_dtype).itemsize
    # VMEM budget: double-buffered batch-tile streams + resident weights + slack.
    tile_stream_bytes = 4 * TB * (OBS + A + OUT_W)
    resident_bytes = w_bytes * (OBS * HID + HID * 2 * A) + 4 * (HID + 2 * A)
    vmem_limit = int(min(64 << 20,
                         max(16 << 20, 4 * tile_stream_bytes + 2 * resident_bytes + (8 << 20))))

    cost = pl.CostEstimate(
        flops=2 * Bp * (OBS * HID + HID * 2 * A),
        transcendentals=Bp * (HID + 4 * A),
        bytes_accessed=4 * Bp * (OBS + A + OUT_W)
        + w_bytes * (OBS * HID + HID * 2 * A) + 4 * (HID + 2 * A),
    )

    out = pl.pallas_call(
        _tanh_policy_kernel,
        out_shape=jax.ShapeDtypeStruct((Bp, OUT_W), jnp.float32),
        grid=grid,
        in_specs=[
            pl.BlockSpec((TB, OBS), lambda i: (i, 0)),      # obs: streamed per tile
            pl.BlockSpec((OBS, HID), lambda i: (0, 0)),     # w1: resident
            pl.BlockSpec((1, HID), lambda i: (0, 0)),       # b1: resident
            pl.BlockSpec((HID, 2 * A), lambda i: (0, 0)),   # fused head weight: resident
            pl.BlockSpec((1, 2 * A), lambda i: (0, 0)),     # fused head bias: resident
            pl.BlockSpec((TB, A), lambda i: (i, 0)),        # eps: streamed per tile
        ],
        out_specs=pl.BlockSpec((TB, OUT_W), lambda i: (i, 0)),
        compiler_params=pltpu.CompilerParams(
            dimension_semantics=("parallel",),
            vmem_limit_bytes=vmem_limit,
        ),
        cost_estimate=cost,
    )(obs, w1, b1, whead, bhead, eps)

    out = out[:B]
    action = out[:, :A]
    pre_action = out[:, A:2 * A]
    log_prob = out[:, 2 * A:2 * A + 1]          # exact (B, 1) keepdim shape
    pre_lp = out[:, 2 * A + 1:2 * A + 2]        # exact (B, 1) keepdim shape

    # TODO(synk): eps could be generated in-kernel via pltpu.prng_seed +
    # pltpu.stateful_normal to drop one HBM stream, but external eps is kept for
    # exact reproducibility vs. the reference.
    info = {
        "pretanh_log_prob": pre_lp,
        "log_prob": log_prob,
        "pretanh_action": pre_action,
    }
    return action, info


def _reference(obs, params, eps):
    h = jnp.tanh(obs @ params["w1"] + params["b1"])
    mean = h @ params["wm"] + params["bm"]
    log_std = jnp.clip(h @ params["ws"] + params["bs"], -20.0, 2.0)
    std = jnp.exp(log_std)
    pre_action = mean + std * eps
    pre_lp = jnp.sum(-0.5 * eps * eps - log_std - 0.5 * LOG_2PI, axis=-1,
                     keepdims=True)
    action = jnp.tanh(pre_action)
    log_prob = pre_lp - jnp.sum(jnp.log(1.0 - action * action + 1e-8), axis=-1,
                                keepdims=True)
    return action, log_prob, pre_action, pre_lp


if __name__ == "__main__":
    B, OBS, HID, ACT = 8, 16, 32, 8

    key = jax.random.PRNGKey(0)
    k_obs, k_w1, k_wm, k_ws, k_eps = jax.random.split(key, 5)

    obs = jax.random.normal(k_obs, (B, OBS), dtype=jnp.float32)
    params = {
        "w1": jax.random.normal(k_w1, (OBS, HID), dtype=jnp.float32) * (1.0 / math.sqrt(OBS)),
        "b1": jnp.zeros((1, HID), dtype=jnp.float32),
        "wm": jax.random.normal(k_wm, (HID, ACT), dtype=jnp.float32) * (1.0 / math.sqrt(HID)),
        "bm": jnp.zeros((1, ACT), dtype=jnp.float32),
        "ws": jax.random.normal(k_ws, (HID, ACT), dtype=jnp.float32) * (1.0 / math.sqrt(HID)),
        "bs": jnp.full((1, ACT), -1.0, dtype=jnp.float32),
    }
    eps = jax.random.normal(k_eps, (B, ACT), dtype=jnp.float32)

    # f32 matmul path: exact check vs pure-JAX reference.
    action, info = tanh_policy_forward(obs, params, eps, matmul_dtype=jnp.float32)
    jax.block_until_ready((action, info))

    ra, rlp, rpa, rplp = _reference(obs, params, eps)
    assert jnp.allclose(action, ra, atol=1e-5, rtol=1e-5)
    assert jnp.allclose(info["log_prob"], rlp, atol=1e-5, rtol=1e-5)
    assert jnp.allclose(info["pretanh_action"], rpa, atol=1e-5, rtol=1e-5)
    assert jnp.allclose(info["pretanh_log_prob"], rplp, atol=1e-5, rtol=1e-5)

    # bf16 MXU-input path (f32 accumulate, f32 elementwise): loose sanity check.
    action_bf, info_bf = tanh_policy_forward(obs, params, eps, matmul_dtype=jnp.bfloat16)
    jax.block_until_ready((action_bf, info_bf))
    assert jnp.allclose(action_bf, ra, atol=5e-2)
    assert bool(jnp.all(jnp.isfinite(info_bf["log_prob"])))

    print("KERNEL_OK")
</pallas_src>

<mosaic_0001>
module attributes {stable_mosaic.version = 11 : i64} {
  func.func @_tanh_policy_kernel(%arg0: i32, %arg1: memref<8x16xf32, #tpu.memory_space<vmem>>, %arg2: memref<16x32xf32, #tpu.memory_space<vmem>>, %arg3: memref<1x32xf32, #tpu.memory_space<vmem>>, %arg4: memref<32x16xf32, #tpu.memory_space<vmem>>, %arg5: memref<1x16xf32, #tpu.memory_space<vmem>>, %arg6: memref<8x8xf32, #tpu.memory_space<vmem>>, %arg7: memref<8x18xf32, #tpu.memory_space<vmem>>) attributes {dimension_semantics = [#tpu.dimension_semantics<parallel>], iteration_bounds = array<i64: 1>, scalar_prefetch = 0 : i64, scratch_operands = 0 : i64, tpu.core_type = #tpu.core_type<tc>, window_params = [{transform_indices = @transform_0, window_bounds = array<i64: 8, 16>}, {pipeline_mode = #tpu.pipeline_mode<synchronous>, transform_indices = @transform_1, window_bounds = array<i64: 16, 32>}, {pipeline_mode = #tpu.pipeline_mode<synchronous>, transform_indices = @transform_2, window_bounds = array<i64: 1, 32>}, {pipeline_mode = #tpu.pipeline_mode<synchronous>, transform_indices = @transform_3, window_bounds = array<i64: 32, 16>}, {pipeline_mode = #tpu.pipeline_mode<synchronous>, transform_indices = @transform_4, window_bounds = array<i64: 1, 16>}, {transform_indices = @transform_5, window_bounds = array<i64: 8, 8>}, {transform_indices = @transform_6, window_bounds = array<i64: 8, 18>}]} {
    %c0 = arith.constant 0 : index
    %c0_0 = arith.constant 0 : index
    %0 = vector.load %arg1[%c0, %c0_0] : memref<8x16xf32, #tpu.memory_space<vmem>>, vector<8x16xf32>
    %c0_1 = arith.constant 0 : index
    %c0_2 = arith.constant 0 : index
    %1 = vector.load %arg2[%c0_1, %c0_2] : memref<16x32xf32, #tpu.memory_space<vmem>>, vector<16x32xf32>
    %cst = arith.constant dense<0.000000e+00> : vector<8x32xf32>
    %2 = tpu.matmul %0, %1, %cst {dimension_numbers = #tpu.dot_dimension_numbers<[1], [0], [0], [1], [0, 0, 1, 1], [], []>} : vector<8x16xf32>, vector<16x32xf32>, vector<8x32xf32> -> vector<8x32xf32>
    %c0_3 = arith.constant 0 : index
    %c0_4 = arith.constant 0 : index
    %3 = vector.load %arg3[%c0_3, %c0_4] : memref<1x32xf32, #tpu.memory_space<vmem>>, vector<1x32xf32>
    %4 = vector.broadcast %3 : vector<1x32xf32> to vector<8x32xf32>
    %5 = arith.addf %2, %4 : vector<8x32xf32>
    %6 = math.tanh %5 : vector<8x32xf32>
    %c0_5 = arith.constant 0 : index
    %c0_6 = arith.constant 0 : index
    %7 = vector.load %arg4[%c0_5, %c0_6] : memref<32x16xf32, #tpu.memory_space<vmem>>, vector<32x16xf32>
    %cst_7 = arith.constant dense<0.000000e+00> : vector<8x16xf32>
    %8 = tpu.matmul %6, %7, %cst_7 {dimension_numbers = #tpu.dot_dimension_numbers<[1], [0], [0], [1], [0, 0, 1, 1], [], []>} : vector<8x32xf32>, vector<32x16xf32>, vector<8x16xf32> -> vector<8x16xf32>
    %c0_8 = arith.constant 0 : index
    %c0_9 = arith.constant 0 : index
    %9 = vector.load %arg5[%c0_8, %c0_9] : memref<1x16xf32, #tpu.memory_space<vmem>>, vector<1x16xf32>
    %10 = vector.broadcast %9 : vector<1x16xf32> to vector<8x16xf32>
    %11 = arith.addf %8, %10 : vector<8x16xf32>
    %12 = vector.extract_strided_slice %11 {offsets = [0, 0], sizes = [8, 8], strides = [1, 1]} : vector<8x16xf32> to vector<8x8xf32>
    %13 = vector.extract_strided_slice %11 {offsets = [0, 8], sizes = [8, 8], strides = [1, 1]} : vector<8x16xf32> to vector<8x8xf32>
    %cst_10 = arith.constant -2.000000e+01 : f32
    %cst_11 = arith.constant 2.000000e+00 : f32
    %14 = vector.broadcast %cst_10 : f32 to vector<8x8xf32>
    %15 = arith.maximumf %14, %13 : vector<8x8xf32>
    %16 = vector.broadcast %cst_11 : f32 to vector<8x8xf32>
    %17 = arith.minimumf %16, %15 : vector<8x8xf32>
    %18 = math.exp %17 : vector<8x8xf32>
    %c0_12 = arith.constant 0 : index
    %c0_13 = arith.constant 0 : index
    %19 = vector.load %arg6[%c0_12, %c0_13] : memref<8x8xf32, #tpu.memory_space<vmem>>, vector<8x8xf32>
    %20 = arith.mulf %18, %19 : vector<8x8xf32>
    %21 = arith.addf %12, %20 : vector<8x8xf32>
    %cst_14 = arith.constant -5.000000e-01 : f32
    %22 = vector.broadcast %cst_14 : f32 to vector<8x8xf32>
    %23 = arith.mulf %22, %19 : vector<8x8xf32>
    %24 = arith.mulf %23, %19 : vector<8x8xf32>
    %25 = arith.subf %24, %17 : vector<8x8xf32>
    %cst_15 = arith.constant 0.918938517 : f32
    %26 = vector.broadcast %cst_15 : f32 to vector<8x8xf32>
    %27 = arith.subf %25, %26 : vector<8x8xf32>
    %cst_16 = arith.constant dense<0.000000e+00> : vector<8xf32>
    %28 = vector.multi_reduction <add>, %27, %cst_16 [1] : vector<8x8xf32> to vector<8xf32>
    %29 = vector.shape_cast %28 : vector<8xf32> to vector<8x1xf32>
    %30 = math.tanh %21 : vector<8x8xf32>
    %31 = arith.mulf %30, %30 : vector<8x8xf32>
    %cst_17 = arith.constant 1.000000e+00 : f32
    %32 = vector.broadcast %cst_17 : f32 to vector<8x8xf32>
    %33 = arith.subf %32, %31 : vector<8x8xf32>
    %cst_18 = arith.constant 9.99999993E-9 : f32
    %34 = vector.broadcast %cst_18 : f32 to vector<8x8xf32>
    %35 = arith.addf %33, %34 : vector<8x8xf32>
    %36 = math.log %35 : vector<8x8xf32>
    %cst_19 = arith.constant dense<0.000000e+00> : vector<8xf32>
    %37 = vector.multi_reduction <add>, %36, %cst_19 [1] : vector<8x8xf32> to vector<8xf32>
    %38 = vector.shape_cast %37 : vector<8xf32> to vector<8x1xf32>
    %39 = arith.subf %29, %38 : vector<8x1xf32>
    %40 = tpu.concatenate %30, %21, %39, %29 in 1 : vector<8x8xf32>, vector<8x8xf32>, vector<8x1xf32>, vector<8x1xf32> -> vector<8x18xf32>
    %c0_20 = arith.constant 0 : index
    %c0_21 = arith.constant 0 : index
    %41 = vector.load %arg7[%c0_20, %c0_21] : memref<8x18xf32, #tpu.memory_space<vmem>>, vector<8x18xf32>
    tpu.vector_store %arg7[%c0_20, %c0_21], %40 {strides = array<i32>} : memref<8x18xf32, #tpu.memory_space<vmem>>, vector<8x18xf32>,
    return
  }
  func.func @transform_0(%arg0: i32) -> (i32, i32) {
    %c0_i32 = arith.constant 0 : i32
    %c0_i32_0 = arith.constant 0 : i32
    return %arg0, %c0_i32 : i32, i32
  }
  func.func @transform_1(%arg0: i32) -> (i32, i32) {
    %c0_i32 = arith.constant 0 : i32
    %c0_i32_0 = arith.constant 0 : i32
    %c0_i32_1 = arith.constant 0 : i32
    return %c0_i32, %c0_i32_0 : i32, i32
  }
  func.func @transform_2(%arg0: i32) -> (i32, i32) {
    %c0_i32 = arith.constant 0 : i32
    %c0_i32_0 = arith.constant 0 : i32
    %c0_i32_1 = arith.constant 0 : i32
    return %c0_i32, %c0_i32_0 : i32, i32
  }
  func.func @transform_3(%arg0: i32) -> (i32, i32) {
    %c0_i32 = arith.constant 0 : i32
    %c0_i32_0 = arith.constant 0 : i32
    %c0_i32_1 = arith.constant 0 : i32
    return %c0_i32, %c0_i32_0 : i32, i32
  }
  func.func @transform_4(%arg0: i32) -> (i32, i32) {
    %c0_i32 = arith.constant 0 : i32
    %c0_i32_0 = arith.constant 0 : i32
    %c0_i32_1 = arith.constant 0 : i32
    return %c0_i32, %c0_i32_0 : i32, i32
  }
  func.func @transform_5(%arg0: i32) -> (i32, i32) {
    %c0_i32 = arith.constant 0 : i32
    %c0_i32_0 = arith.constant 0 : i32
    return %arg0, %c0_i32 : i32, i32
  }
  func.func @transform_6(%arg0: i32) -> (i32, i32) {
    %c0_i32 = arith.constant 0 : i32
    %c0_i32_0 = arith.constant 0 : i32
    return %arg0, %c0_i32 : i32, i32
  }
}

</mosaic_0001>

<bundles_post_ra>
// kernel: tpu_custom_call.1
= control target key start
LH: loop header
LB: loop body
LE: loop exit
PB: predicated region body
PF: predicated region fallthrough
CT: control target
= control target key end

     0   :  { %v321_v1 = vmov 0.0   ;;  %vm322_vm0 = vmmov 0   ;;  %s401_s0 = inlined_call_operand.vmem [shape: f32[8,16], index: 0, kind: input, shape index: {}]   ;;  %s402_s1 = inlined_call_operand.vmem [shape: f32[16,32], index: 1, kind: input, shape index: {}]   ;;  %s403_s2 = inlined_call_operand.vmem [shape: f32[1,32], index: 2, kind: input, shape index: {}]   ;;  %s404_s3 = inlined_call_operand.vmem [shape: f32[32,16], index: 3, kind: input, shape index: {}]   ;;  %s405_s4 = inlined_call_operand.vmem [shape: f32[1,16], index: 4, kind: input, shape index: {}]   ;;  %s406_s5 = inlined_call_operand.vmem [shape: f32[8,8], index: 5, kind: input, shape index: {}]   ;;  %s407_s6 = inlined_call_operand.hbm [shape: f32[8,18], index: 6, kind: output, shape index: {}]  }
   0x1   :  { %v26_v0 = vld [vmem:[%s402_s1 + $0x8] sm:$0xff]  ;;  %268 = vmatprep.subr.mxu0 %v321_v1  ;;  %v25_v2 = vld [vmem:[%s402_s1] sm:$0xff]  ;;  %272 = vmatprep.mubr.msk.f32.mxu0 %vm322_vm0, %v321_v1 }
   0x2   :  { %11 = vsyncpa [#allocation3], 0  ;;  %269 = vmatpush3.msra.mxu0 %v26_v0  ;;  %v24_v3 = vld [vmem:[%s401_s0] sm:$0xff]  ;;  %vm34_vm1 = vcmask 130048   ;;  %275 = vmatprep.subr.mxu1 %v321_v1  ;;  %v112_v4 = vld [vmem:[%s404_s3 + $0x18] sm:$0xff]  ;;  %s323_s11 = smov 8  }
   0x3   :  { %270 = vmatprep.subr.mxu0 %v321_v1  ;;  %283 = vmatprep.mubr.msk.f32.mxu1 %vm322_vm0, %v321_v1  ;;  %v111_v5 = vld [vmem:[%s404_s3 + $0x10] sm:$0xff]  ;;  %v110_v6 = vld [vmem:[%s404_s3 + $0x8] sm:$0xff]  ;;  %v109_v7 = vld [vmem:[%s404_s3] sm:$0xff]  ;;  %vm120_vm2 = vcmask 261120   ;;  %vm217_vm3 = vcmask 64512   ;;  %vm237_vm4 = vcmask 138240  }
   0x4   :  { %271 = vmatpush3.msra.mxu0 %v25_v2  ;;  %276 = vmatpush3.msra.mxu1 %v112_v4  ;;  %v198_v8 = vld [vmem:[%s406_s5] sm:$0xff]  ;;  %s324_s5 = smov 120   ;;  %vm239_vm5 = vcmask 146432  }
   0x5   :  { %273 = vmatmul.mubr.msk.f32.vlgmr.msra.gmra.mxu0 %vm34_vm1, %v24_v3  ;;  %277 = vmatprep.subr.mxu1 %v321_v1  ;;  %v255_v9 = vld [vmem:[%s403_s2] ss:$0 sm:$0xff]  ;;  %v209_v24 = vmul.f32 -0.5, %v198_v8  ;;  %s325_s2 = smov [#allocation2]  }
   0x6   :  { %278 = vmatpush3.msra.mxu1 %v111_v5  ;;  %200 = vrot.lane.b32.xlu0 %v198_v8, %s323_s11  ;;  %v257_v14 = vld [vmem:[%s405_s4] ss:$0 sm:$0xff]  ;;  %s247_s4 = sshll.u32 %s325_s2, 4  ;;  %s248_s4 = int_to_ptr.vmem [resolvable:$true] %s247_s4 }
   0x7   :  { %279 = vmatprep.subr.mxu1 %v321_v1  ;;  %v210_v25 = vmul.f32 %v209_v24, %v198_v8  ;;  %s299_s15 = scalar_lea.vmem %s248_s4, 128  ;;  %p304_p1 = scmp.lt.s32.totalorder %s248_s4, %s248_s4 }
   0x8   :  { %280 = vmatpush3.msra.mxu1 %v110_v6  ;;  %p300_p0 = scmp.ne.s32.totalorder %s248_s4, %s299_s15  ;;  %p305_p2 = scmp.lt.s32.totalorder %s299_s15, %s299_s15 }
   0x9   :  { %281 = vmatprep.subr.mxu1 %v321_v1 }
   0xa   :  { %282 = vmatpush3.msra.mxu1 %v109_v7  ;;  %p306_p3 = por %p305_p2, %p304_p1 }
   0xc   :  { %p307_p4 = pnand %p306_p3, %p300_p0 }
  0x78   :  { %v201_v21 = vpop.permute.xlu0 %200 }
  0xc5   :  { %v104_v10 = vpop.f32.mrf.mxu0 }
  0xc6   :  { %v105_v11 = vadd.f32 %v255_v9, %v104_v10 }
  0xc7   :  { %v274_v12 = vpop.f32.mrf.mxu0 }
  0xc8   :  { %291 = vtanh.f32 %v105_v11 }
  0xd5   :  { %v292_v13 = vpop.eup %291 }
  0xd6   :  { %284 = vmatmul.mubr.msk.f32.vlgmr.msra.gmra.mxu1 %vm120_vm2, %v292_v13 }
 0x196   :  { %v190_v15 = vpop.f32.mrf.mxu1 }
 0x197   :  { %v191_v16 = vadd.f32 %v257_v14, %v190_v15 }
 0x198   :  { %v285_v17 = vpop.f32.mrf.mxu1 }
 0x199   :  { %v194_v18 = vmax.f32 %v191_v16, -20.0 }
 0x19b   :  { %v195_v19 = vmin.f32 %v194_v18, 2.0 }
 0x19d   :  { %212 = vrot.lane.b32.xlu1 %v195_v19, %s324_s5  ;;  %v196_v20 = vmul.f32 1.442695, %v195_v19 }
 0x19f   :  { %293 = vpow2.f32 %v196_v20 }
 0x1ac   :  { %v294_v22 = vpop.eup %293 }
 0x1ad   :  { %v203_v23 = vmul.f32 %v294_v22, %v201_v21 }
 0x1af   :  { %205 = vrot.lane.b32.xlu0 %v203_v23, %s324_s5 }
 0x20f   :  { %v213_v26 = vpop.permute.xlu1 %212 }
 0x210   :  { %v215_v27 = vsub.f32 %v210_v25, %v213_v26 }
 0x212   :  { %v259_v28 = vadd.f32 -0.9189385, %v215_v27 }
 0x214   :  { %v218_v29 = vsel %vm217_vm3, %v259_v28, 0.0 }
 0x215   :  { %219 = vadd.xlane.f32.xlu1 %v218_v29 }
 0x221   :  { %v206_v30 = vpop.permute.xlu0 %205 }
 0x222   :  { %v208_v31 = vadd.f32 %v206_v30, %v191_v16 }
 0x224   :  { %295 = vtanh.f32 %v208_v31 }
 0x231   :  { %v296_v32 = vpop.eup %295 }
 0x232   :  { %v222_v33 = vmul.f32 %v296_v32, %v296_v32 }
 0x234   :  { %v223_v34 = vsub.f32 1.0, %v222_v33 }
 0x236   :  { %v224_v35 = vadd.f32 1e-08, %v223_v34 }
 0x238   :  { %297 = vlog2.f32 %v224_v35 }
 0x245   :  { %v298_v36 = vpop.eup %297 }
 0x246   :  { %v226_v37 = vmul.f32 0.6931472, %v298_v36 }
 0x248   :  { %v227_v38 = vsel %vm217_vm3, %v226_v37, 0.0 }
 0x249   :  { %228 = vadd.xlane.f32.xlu0 %v227_v38 }
 0x25f   :  { %232 = vrot.lane.b32.xlu0 %v208_v31, %s323_s11 }
 0x29e   :  { %v220_v40 = vpop.xlane.xlu1 %219 }
 0x2d2   :  { %v229_v39 = vpop.xlane.xlu0 %228 }
 0x2d3   :  { %v230_v41 = vsub.f32 %v220_v40, %v229_v39 }
 0x2d6   :  { %v233_v42 = vpop.permute.xlu0 %232 }
 0x2d7   :  { %v235_v43 = vsel %vm217_vm3, %v296_v32, %v233_v42 }
 0x2d8   :  { %v236_v44 = vsel %vm34_vm1, %v235_v43, %v230_v41 }
 0x2d9   :  { %v238_v45 = vsel %vm237_vm4, %v236_v44, %v220_v40 }
 0x2da   :  { %240 = vst.msk [vmem:[#allocation2] sm:$0xff] %vm239_vm5, %v238_v45 }
 0x2db   :  { %310 = shalt.err (!%p307_p4)
}
 0x2dc   :  { %250 = dma.vmem_to_hbm [thread:$0]  %s248_s4, 128, %s407_s6, [#allocation3]  }
 0x2dd   :  { %319 = dma.done.wait [#allocation3], 128  }
 0x2de   :  { %320 = vsyncadd [#allocation3], 4294967168 }
 0x2df   :  { %254 = vsyncpa [#allocation3], 1 }

</bundles_post_ra>
